<compile_context>
chip_gen: v6e
topology: v6e:2x2x1
jax: 0.10.0
libtpu: 0.0.40
codegen_flags: <defaults>
</compile_context>

<pallas_src>
import functools

import numpy as np
import jax
import jax.numpy as jnp
from jax.experimental import pallas as pl
from jax.experimental.pallas import tpu as pltpu

# ~256K f32 elements (~1 MiB) per pipelined output block: big enough to reach
# ~85% of HBM roofline on v5e/v6e, small enough that the blend kernel's
# double-buffered footprint (9 buffers/block) stays well under v7x's 64 MiB.
TARGET_BLOCK_ELEMS = 256 * 1024


def _pick_block(D, HW):
    """Choose a D-axis block size BD and padded extent Dp."""
    BD = max(1, min(D, TARGET_BLOCK_ELEMS // max(HW, 1)))
    if BD >= D and D >= 16:
        BD = (D + 1) // 2                 # keep grid >= 2 steps for v7x megacore
    if BD < D:
        BD = max(8, (BD // 8) * 8)        # sublane-tiling rule: multiple of 8
    Dp = -(-D // BD) * BD                 # pad D up so the grid divides evenly
    return BD, Dp


def _vmem_limit_bytes(BD, HW):
    # blend kernel dominates: (8 corner blocks + 1 output block), double-buffered,
    # plus the small (2, HW) template and some compiler scratch margin.
    need = 2 * (9 * BD * HW * 4 + 2 * HW * 4) + (4 << 20)
    return int(min(max(need, 8 << 20), 48 << 20))


def _affine_coords(t_ref, jk_ref, BD, HW):
    """Regenerate the warped coordinates for the current D-block (in-kernel)."""
    base = (pl.program_id(0) * BD).astype(jnp.float32)
    i_f = base + jax.lax.broadcasted_iota(jnp.int32, (BD, HW), 0).astype(jnp.float32)
    jk = jk_ref[...]                      # (2, HW) tiny constant template
    j_f = jk[0:1, :]                      # (1, HW), broadcasts over rows
    k_f = jk[1:2, :]
    di = t_ref[0] * i_f + t_ref[1] * j_f + t_ref[2] * k_f + t_ref[3]
    dj = t_ref[4] * i_f + t_ref[5] * j_f + t_ref[6] * k_f + t_ref[7]
    dk = t_ref[8] * i_f + t_ref[9] * j_f + t_ref[10] * k_f + t_ref[11]
    return di, dj, dk


# -----------------------------------------------------------------------------
# Kernel 1: in-kernel voxel-grid generation + affine warp -> flat corner-index
# stack (8, BD, HW).  Only 4 B/voxel per corner of int32 is written; no weight
# or flag intermediates touch HBM.
# -----------------------------------------------------------------------------
def _index_kernel(t_ref, jk_ref, idx_ref, *, D, H, W, BD):
    HW = H * W
    di, dj, dk = _affine_coords(t_ref, jk_ref, BD, HW)

    fx = jnp.clip(jnp.floor(di), 0.0, D - 1.0).astype(jnp.int32)
    fy = jnp.clip(jnp.floor(dj), 0.0, H - 1.0).astype(jnp.int32)
    fz = jnp.clip(jnp.floor(dk), 0.0, W - 1.0).astype(jnp.int32)

    # flat index into the (D, H, W) volume: (x*H + y)*W + z
    i000 = (fx * H + fy) * W + fz

    # +1 corner offsets are constant and unclamped; the gather clips them.
    # Exact because whenever the upper-boundary clamp would matter for an
    # in-bounds voxel, the corresponding fractional weight is exactly 0.
    idx_ref[0] = i000                      # fff
    idx_ref[1] = i000 + HW                 # cff
    idx_ref[2] = i000 + W                  # fcf
    idx_ref[3] = i000 + (HW + W)           # ccf
    idx_ref[4] = i000 + 1                  # ffc
    idx_ref[5] = i000 + (HW + 1)           # cfc
    idx_ref[6] = i000 + (W + 1)            # fcc
    idx_ref[7] = i000 + (HW + W + 1)       # ccc


# -----------------------------------------------------------------------------
# Kernel 2: trilinear blend of the 8 gathered corners.  The affine warp, the
# fractional weights and the in-bounds mask are recomputed in-kernel from the
# 12 SMEM scalars (bitwise identical to kernel 1's coords), so no per-voxel
# weight/mask intermediates are read from HBM.
# -----------------------------------------------------------------------------
def _blend_kernel(t_ref, jk_ref, c_ref, out_ref, *, D, H, W, BD):
    HW = H * W
    di, dj, dk = _affine_coords(t_ref, jk_ref, BD, HW)

    ok = ((di > 0.0) & (dj > 0.0) & (dk > 0.0) &
          (di <= D - 1.0) & (dj <= H - 1.0) & (dk <= W - 1.0))

    wcx = di - jnp.floor(di)
    wcy = dj - jnp.floor(dj)
    wcz = dk - jnp.floor(dk)
    wfx = 1.0 - wcx
    wfy = 1.0 - wcy
    wfz = 1.0 - wcz

    c00 = c_ref[0] * wfx + c_ref[1] * wcx   # (fff, cff)
    c10 = c_ref[2] * wfx + c_ref[3] * wcx   # (fcf, ccf)
    c01 = c_ref[4] * wfx + c_ref[5] * wcx   # (ffc, cfc)
    c11 = c_ref[6] * wfx + c_ref[7] * wcx   # (fcc, ccc)

    c0 = c00 * wfy + c10 * wcy
    c1 = c01 * wfy + c11 * wcy
    out_ref[...] = jnp.where(ok, c0 * wfz + c1 * wcz, 0.0)   # NaN-safe masking


# -----------------------------------------------------------------------------
# Wrapper (glue): block sizing, templates, stacked gather, reshape back.
# -----------------------------------------------------------------------------
def instance_model_forward(image_targ, T, image_shape):
    D, H, W = image_shape
    HW = H * W
    vol = image_targ[0, 0].astype(jnp.float32)        # (D, H, W)
    flat_vol = vol.reshape(-1)

    BD, Dp = _pick_block(D, HW)
    grid = (Dp // BD,)

    # tiny (2, HW) j/k template: j = row // W, k = row % W without in-kernel div/mod
    jj, kk = jnp.meshgrid(jnp.arange(H, dtype=jnp.float32),
                          jnp.arange(W, dtype=jnp.float32), indexing="ij")
    jk = jnp.stack([jj.reshape(-1), kk.reshape(-1)])   # (2, HW)

    t12 = jnp.asarray(T, dtype=jnp.float32)[:3, :].reshape(-1)   # (12,) in SMEM

    row_spec = pl.BlockSpec((BD, HW), lambda d: (d, 0))
    stack_spec = pl.BlockSpec((8, BD, HW), lambda d: (0, d, 0))
    jk_spec = pl.BlockSpec((2, HW), lambda d: (0, 0))
    t_spec = pl.BlockSpec(memory_space=pltpu.MemorySpace.SMEM)

    params = pltpu.CompilerParams(
        dimension_semantics=("parallel",),
        vmem_limit_bytes=_vmem_limit_bytes(BD, HW),
    )

    idx = pl.pallas_call(
        functools.partial(_index_kernel, D=D, H=H, W=W, BD=BD),
        out_shape=jax.ShapeDtypeStruct((8, Dp, HW), jnp.int32),
        grid=grid,
        in_specs=[t_spec, jk_spec],
        out_specs=stack_spec,
        compiler_params=params,
    )(t12, jk)

    # TODO(synk): the data-dependent 8-corner gather has no guaranteed dense
    # Pallas-TPU vector lowering, so it stays as ONE stacked XLA gather between
    # the two Pallas kernels (indices from kernel 1, blend in kernel 2).
    # mode="clip" keeps the unclamped +1 offsets in range (numerically exact:
    # the matching fractional weight is 0 whenever clipping would matter).
    corners = jnp.take(flat_vol, idx, axis=0, mode="clip")   # (8, Dp, HW) f32

    image_reg_2d = pl.pallas_call(
        functools.partial(_blend_kernel, D=D, H=H, W=W, BD=BD),
        out_shape=jax.ShapeDtypeStruct((Dp, HW), jnp.float32),
        grid=grid,
        in_specs=[t_spec, jk_spec, stack_spec],
        out_specs=row_spec,
        compiler_params=params,
    )(t12, jk, corners)

    image_reg = image_reg_2d[:D].reshape(D, H, W)
    return image_reg[None, None]                        # (1, 1, D, H, W)


# -----------------------------------------------------------------------------
# Deterministic parameter / matrix construction (glue; mirrors _compute_rotation
# and _compute_matrix). The abstract _compute_ras_matrix is realized as a rigid
# transform with fixed rotation angles + translation.
# -----------------------------------------------------------------------------
def build_T(image_shape):
    a, b, c = 0.10, -0.05, 0.08          # rotation angles (rad), deterministic
    tx, ty, tz = 1.5, -2.0, 0.5          # translation, deterministic
    Rx = np.array([[1, 0, 0],
                   [0, np.cos(a), -np.sin(a)],
                   [0, np.sin(a), np.cos(a)]])
    Ry = np.array([[np.cos(b), 0, np.sin(b)],
                   [0, 1, 0],
                   [-np.sin(b), 0, np.cos(b)]])
    Rz = np.array([[np.cos(c), -np.sin(c), 0],
                   [np.sin(c), np.cos(c), 0],
                   [0, 0, 1]])
    Rmat = Rx @ Ry @ Rz                   # matmul(matmul(Rx, Ry), Rz)
    T_rig = np.eye(4)
    T_rig[:3, :3] = Rmat
    T_rig[:3, 3] = [tx, ty, tz]

    center = (np.asarray(image_shape, dtype=np.float64) - 1.0) / 2.0
    ref_v2r = np.eye(4); ref_v2r[:3, 3] = -center
    flo_v2r = np.eye(4); flo_v2r[:3, 3] = -center

    return np.linalg.inv(flo_v2r) @ T_rig @ ref_v2r


# -----------------------------------------------------------------------------
# Pure NumPy reference of the forward pass (float32, same op order).
# -----------------------------------------------------------------------------
def reference_forward(image_targ, T, image_shape):
    D, H, W = image_shape
    X = np.asarray(image_targ)[0, 0].astype(np.float32)
    T = np.asarray(T, dtype=np.float32)
    gi, gj, gk = np.meshgrid(np.arange(D, dtype=np.float32),
                             np.arange(H, dtype=np.float32),
                             np.arange(W, dtype=np.float32), indexing="ij")
    di = T[0, 0] * gi + T[0, 1] * gj + T[0, 2] * gk + T[0, 3]
    dj = T[1, 0] * gi + T[1, 1] * gj + T[1, 2] * gk + T[1, 3]
    dk = T[2, 0] * gi + T[2, 1] * gj + T[2, 2] * gk + T[2, 3]
    ok = ((di > 0) & (dj > 0) & (dk > 0) &
          (di <= D - 1) & (dj <= H - 1) & (dk <= W - 1))
    fxf, fyf, fzf = np.floor(di), np.floor(dj), np.floor(dk)
    wcx, wcy, wcz = di - fxf, dj - fyf, dk - fzf
    wfx, wfy, wfz = 1 - wcx, 1 - wcy, 1 - wcz
    fx = np.clip(fxf, 0, D - 1).astype(np.int32); cx = np.clip(fxf + 1, 0, D - 1).astype(np.int32)
    fy = np.clip(fyf, 0, H - 1).astype(np.int32); cy = np.clip(fyf + 1, 0, H - 1).astype(np.int32)
    fz = np.clip(fzf, 0, W - 1).astype(np.int32); cz = np.clip(fzf + 1, 0, W - 1).astype(np.int32)
    c000 = X[fx, fy, fz]; c100 = X[cx, fy, fz]; c010 = X[fx, cy, fz]; c110 = X[cx, cy, fz]
    c001 = X[fx, fy, cz]; c101 = X[cx, fy, cz]; c011 = X[fx, cy, cz]; c111 = X[cx, cy, cz]
    c00 = c000 * wfx + c100 * wcx; c01 = c001 * wfx + c101 * wcx
    c10 = c010 * wfx + c110 * wcx; c11 = c011 * wfx + c111 * wcx
    c0 = c00 * wfy + c10 * wcy; c1 = c01 * wfy + c11 * wcy
    c = c0 * wfz + c1 * wcz
    out = np.where(ok, c, 0.0).astype(np.float32)
    # "safe" mask: voxels whose coords are far from the in/out-of-bounds
    # thresholds, so f32 rounding differences cannot flip the mask.
    eps = 1e-3
    far = lambda v, hi: (np.abs(v - 0.0) > eps) & (np.abs(v - hi) > eps)
    safe = far(di, D - 1) & far(dj, H - 1) & far(dk, W - 1)
    return out[None, None], safe


if __name__ == "__main__":
    image_shape = (16, 16, 16)
    D, H, W = image_shape

    key = jax.random.PRNGKey(0)
    image_targ = jax.random.normal(key, (1, 1, D, H, W), dtype=jnp.float32)

    T = jnp.asarray(build_T(image_shape), dtype=jnp.float32)

    out = instance_model_forward(image_targ, T, image_shape)
    out = jax.block_until_ready(out)
    assert out.shape == (1, 1, D, H, W) and out.dtype == jnp.float32

    ref, safe = reference_forward(image_targ, T, image_shape)
    diff = np.abs(np.asarray(out) - ref)[0, 0]
    max_err = float(np.max(diff[safe]))
    assert max_err < 1e-3, f"max error {max_err}"

    print("KERNEL_OK")
</pallas_src>

<mosaic_0001>
module attributes {stable_mosaic.version = 11 : i64} {
  func.func @_index_kernel(%arg0: i32, %arg1: memref<12xf32, #tpu.memory_space<smem>>, %arg2: memref<2x256xf32, #tpu.memory_space<vmem>>, %arg3: memref<8x8x256xi32, #tpu.memory_space<vmem>>) attributes {dimension_semantics = [#tpu.dimension_semantics<parallel>], iteration_bounds = array<i64: 2>, scalar_prefetch = 0 : i64, scratch_operands = 0 : i64, tpu.core_type = #tpu.core_type<tc>, window_params = [{transform_indices = @transform_0, window_bounds = array<i64: 12>}, {pipeline_mode = #tpu.pipeline_mode<synchronous>, transform_indices = @transform_1, window_bounds = array<i64: 2, 256>}, {transform_indices = @transform_2, window_bounds = array<i64: 8, 8, 256>}]} {
    %c8_i32 = arith.constant 8 : i32
    %0 = arith.muli %arg0, %c8_i32 : i32
    %1 = arith.sitofp %0 : i32 to f32
    %2 = tpu.iota {dimensions = array<i32: 0>} : vector<8x256xi32>
    %3 = arith.sitofp %2 : vector<8x256xi32> to vector<8x256xf32>
    %4 = vector.broadcast %1 : f32 to vector<8x256xf32>
    %5 = arith.addf %4, %3 : vector<8x256xf32>
    %c0 = arith.constant 0 : index
    %c0_0 = arith.constant 0 : index
    %6 = vector.load %arg2[%c0, %c0_0] : memref<2x256xf32, #tpu.memory_space<vmem>>, vector<2x256xf32>
    %7 = vector.extract_strided_slice %6 {offsets = [0, 0], sizes = [1, 256], strides = [1, 1]} : vector<2x256xf32> to vector<1x256xf32>
    %8 = vector.extract_strided_slice %6 {offsets = [1, 0], sizes = [1, 256], strides = [1, 1]} : vector<2x256xf32> to vector<1x256xf32>
    %c0_1 = arith.constant 0 : index
    %9 = memref.load %arg1[%c0_1] : memref<12xf32, #tpu.memory_space<smem>>
    %10 = vector.broadcast %9 : f32 to vector<8x256xf32>
    %11 = arith.mulf %10, %5 : vector<8x256xf32>
    %c1 = arith.constant 1 : index
    %12 = memref.load %arg1[%c1] : memref<12xf32, #tpu.memory_space<smem>>
    %13 = vector.broadcast %12 : f32 to vector<1x256xf32>
    %14 = arith.mulf %13, %7 : vector<1x256xf32>
    %15 = vector.broadcast %14 : vector<1x256xf32> to vector<8x256xf32>
    %16 = arith.addf %11, %15 : vector<8x256xf32>
    %c2 = arith.constant 2 : index
    %17 = memref.load %arg1[%c2] : memref<12xf32, #tpu.memory_space<smem>>
    %18 = vector.broadcast %17 : f32 to vector<1x256xf32>
    %19 = arith.mulf %18, %8 : vector<1x256xf32>
    %20 = vector.broadcast %19 : vector<1x256xf32> to vector<8x256xf32>
    %21 = arith.addf %16, %20 : vector<8x256xf32>
    %c3 = arith.constant 3 : index
    %22 = memref.load %arg1[%c3] : memref<12xf32, #tpu.memory_space<smem>>
    %23 = vector.broadcast %22 : f32 to vector<8x256xf32>
    %24 = arith.addf %21, %23 : vector<8x256xf32>
    %c4 = arith.constant 4 : index
    %25 = memref.load %arg1[%c4] : memref<12xf32, #tpu.memory_space<smem>>
    %26 = vector.broadcast %25 : f32 to vector<8x256xf32>
    %27 = arith.mulf %26, %5 : vector<8x256xf32>
    %c5 = arith.constant 5 : index
    %28 = memref.load %arg1[%c5] : memref<12xf32, #tpu.memory_space<smem>>
    %29 = vector.broadcast %28 : f32 to vector<1x256xf32>
    %30 = arith.mulf %29, %7 : vector<1x256xf32>
    %31 = vector.broadcast %30 : vector<1x256xf32> to vector<8x256xf32>
    %32 = arith.addf %27, %31 : vector<8x256xf32>
    %c6 = arith.constant 6 : index
    %33 = memref.load %arg1[%c6] : memref<12xf32, #tpu.memory_space<smem>>
    %34 = vector.broadcast %33 : f32 to vector<1x256xf32>
    %35 = arith.mulf %34, %8 : vector<1x256xf32>
    %36 = vector.broadcast %35 : vector<1x256xf32> to vector<8x256xf32>
    %37 = arith.addf %32, %36 : vector<8x256xf32>
    %c7 = arith.constant 7 : index
    %38 = memref.load %arg1[%c7] : memref<12xf32, #tpu.memory_space<smem>>
    %39 = vector.broadcast %38 : f32 to vector<8x256xf32>
    %40 = arith.addf %37, %39 : vector<8x256xf32>
    %c8 = arith.constant 8 : index
    %41 = memref.load %arg1[%c8] : memref<12xf32, #tpu.memory_space<smem>>
    %42 = vector.broadcast %41 : f32 to vector<8x256xf32>
    %43 = arith.mulf %42, %5 : vector<8x256xf32>
    %c9 = arith.constant 9 : index
    %44 = memref.load %arg1[%c9] : memref<12xf32, #tpu.memory_space<smem>>
    %45 = vector.broadcast %44 : f32 to vector<1x256xf32>
    %46 = arith.mulf %45, %7 : vector<1x256xf32>
    %47 = vector.broadcast %46 : vector<1x256xf32> to vector<8x256xf32>
    %48 = arith.addf %43, %47 : vector<8x256xf32>
    %c10 = arith.constant 10 : index
    %49 = memref.load %arg1[%c10] : memref<12xf32, #tpu.memory_space<smem>>
    %50 = vector.broadcast %49 : f32 to vector<1x256xf32>
    %51 = arith.mulf %50, %8 : vector<1x256xf32>
    %52 = vector.broadcast %51 : vector<1x256xf32> to vector<8x256xf32>
    %53 = arith.addf %48, %52 : vector<8x256xf32>
    %c11 = arith.constant 11 : index
    %54 = memref.load %arg1[%c11] : memref<12xf32, #tpu.memory_space<smem>>
    %55 = vector.broadcast %54 : f32 to vector<8x256xf32>
    %56 = arith.addf %53, %55 : vector<8x256xf32>
    %57 = math.floor %24 : vector<8x256xf32>
    %cst = arith.constant 0.000000e+00 : f32
    %cst_2 = arith.constant 1.500000e+01 : f32
    %58 = vector.broadcast %cst : f32 to vector<8x256xf32>
    %59 = arith.maximumf %58, %57 : vector<8x256xf32>
    %60 = vector.broadcast %cst_2 : f32 to vector<8x256xf32>
    %61 = arith.minimumf %60, %59 : vector<8x256xf32>
    %62 = arith.fptosi %61 : vector<8x256xf32> to vector<8x256xi32>
    %63 = math.floor %40 : vector<8x256xf32>
    %cst_3 = arith.constant 0.000000e+00 : f32
    %cst_4 = arith.constant 1.500000e+01 : f32
    %64 = vector.broadcast %cst_3 : f32 to vector<8x256xf32>
    %65 = arith.maximumf %64, %63 : vector<8x256xf32>
    %66 = vector.broadcast %cst_4 : f32 to vector<8x256xf32>
    %67 = arith.minimumf %66, %65 : vector<8x256xf32>
    %68 = arith.fptosi %67 : vector<8x256xf32> to vector<8x256xi32>
    %69 = math.floor %56 : vector<8x256xf32>
    %cst_5 = arith.constant 0.000000e+00 : f32
    %cst_6 = arith.constant 1.500000e+01 : f32
    %70 = vector.broadcast %cst_5 : f32 to vector<8x256xf32>
    %71 = arith.maximumf %70, %69 : vector<8x256xf32>
    %72 = vector.broadcast %cst_6 : f32 to vector<8x256xf32>
    %73 = arith.minimumf %72, %71 : vector<8x256xf32>
    %74 = arith.fptosi %73 : vector<8x256xf32> to vector<8x256xi32>
    %c16_i32 = arith.constant 16 : i32
    %75 = vector.broadcast %c16_i32 : i32 to vector<8x256xi32>
    %76 = arith.muli %62, %75 : vector<8x256xi32>
    %77 = arith.addi %76, %68 : vector<8x256xi32>
    %c16_i32_7 = arith.constant 16 : i32
    %78 = vector.broadcast %c16_i32_7 : i32 to vector<8x256xi32>
    %79 = arith.muli %77, %78 : vector<8x256xi32>
    %80 = arith.addi %79, %74 : vector<8x256xi32>
    %c0_8 = arith.constant 0 : index
    %c0_9 = arith.constant 0 : index
    %c0_10 = arith.constant 0 : index
    %81 = vector.load %arg3[%c0_8, %c0_9, %c0_10] : memref<8x8x256xi32, #tpu.memory_space<vmem>>, vector<1x8x256xi32>
    %82 = vector.shape_cast %81 : vector<1x8x256xi32> to vector<8x256xi32>
    %83 = vector.shape_cast %80 : vector<8x256xi32> to vector<1x8x256xi32>
    tpu.vector_store %arg3[%c0_8, %c0_9, %c0_10], %83 {strides = array<i32>} : memref<8x8x256xi32, #tpu.memory_space<vmem>>, vector<1x8x256xi32>,
    %c256_i32 = arith.constant 256 : i32
    %84 = vector.broadcast %c256_i32 : i32 to vector<8x256xi32>
    %85 = arith.addi %80, %84 : vector<8x256xi32>
    %c1_11 = arith.constant 1 : index
    %c0_12 = arith.constant 0 : index
    %c0_13 = arith.constant 0 : index
    %86 = vector.load %arg3[%c1_11, %c0_12, %c0_13] : memref<8x8x256xi32, #tpu.memory_space<vmem>>, vector<1x8x256xi32>
    %87 = vector.shape_cast %86 : vector<1x8x256xi32> to vector<8x256xi32>
    %88 = vector.shape_cast %85 : vector<8x256xi32> to vector<1x8x256xi32>
    tpu.vector_store %arg3[%c1_11, %c0_12, %c0_13], %88 {strides = array<i32>} : memref<8x8x256xi32, #tpu.memory_space<vmem>>, vector<1x8x256xi32>,
    %c16_i32_14 = arith.constant 16 : i32
    %89 = vector.broadcast %c16_i32_14 : i32 to vector<8x256xi32>
    %90 = arith.addi %80, %89 : vector<8x256xi32>
    %c2_15 = arith.constant 2 : index
    %c0_16 = arith.constant 0 : index
    %c0_17 = arith.constant 0 : index
    %91 = vector.load %arg3[%c2_15, %c0_16, %c0_17] : memref<8x8x256xi32, #tpu.memory_space<vmem>>, vector<1x8x256xi32>
    %92 = vector.shape_cast %91 : vector<1x8x256xi32> to vector<8x256xi32>
    %93 = vector.shape_cast %90 : vector<8x256xi32> to vector<1x8x256xi32>
    tpu.vector_store %arg3[%c2_15, %c0_16, %c0_17], %93 {strides = array<i32>} : memref<8x8x256xi32, #tpu.memory_space<vmem>>, vector<1x8x256xi32>,
    %c272_i32 = arith.constant 272 : i32
    %94 = vector.broadcast %c272_i32 : i32 to vector<8x256xi32>
    %95 = arith.addi %80, %94 : vector<8x256xi32>
    %c3_18 = arith.constant 3 : index
    %c0_19 = arith.constant 0 : index
    %c0_20 = arith.constant 0 : index
    %96 = vector.load %arg3[%c3_18, %c0_19, %c0_20] : memref<8x8x256xi32, #tpu.memory_space<vmem>>, vector<1x8x256xi32>
    %97 = vector.shape_cast %96 : vector<1x8x256xi32> to vector<8x256xi32>
    %98 = vector.shape_cast %95 : vector<8x256xi32> to vector<1x8x256xi32>
    tpu.vector_store %arg3[%c3_18, %c0_19, %c0_20], %98 {strides = array<i32>} : memref<8x8x256xi32, #tpu.memory_space<vmem>>, vector<1x8x256xi32>,
    %c1_i32 = arith.constant 1 : i32
    %99 = vector.broadcast %c1_i32 : i32 to vector<8x256xi32>
    %100 = arith.addi %80, %99 : vector<8x256xi32>
    %c4_21 = arith.constant 4 : index
    %c0_22 = arith.constant 0 : index
    %c0_23 = arith.constant 0 : index
    %101 = vector.load %arg3[%c4_21, %c0_22, %c0_23] : memref<8x8x256xi32, #tpu.memory_space<vmem>>, vector<1x8x256xi32>
    %102 = vector.shape_cast %101 : vector<1x8x256xi32> to vector<8x256xi32>
    %103 = vector.shape_cast %100 : vector<8x256xi32> to vector<1x8x256xi32>
    tpu.vector_store %arg3[%c4_21, %c0_22, %c0_23], %103 {strides = array<i32>} : memref<8x8x256xi32, #tpu.memory_space<vmem>>, vector<1x8x256xi32>,
    %c257_i32 = arith.constant 257 : i32
    %104 = vector.broadcast %c257_i32 : i32 to vector<8x256xi32>
    %105 = arith.addi %80, %104 : vector<8x256xi32>
    %c5_24 = arith.constant 5 : index
    %c0_25 = arith.constant 0 : index
    %c0_26 = arith.constant 0 : index
    %106 = vector.load %arg3[%c5_24, %c0_25, %c0_26] : memref<8x8x256xi32, #tpu.memory_space<vmem>>, vector<1x8x256xi32>
    %107 = vector.shape_cast %106 : vector<1x8x256xi32> to vector<8x256xi32>
    %108 = vector.shape_cast %105 : vector<8x256xi32> to vector<1x8x256xi32>
    tpu.vector_store %arg3[%c5_24, %c0_25, %c0_26], %108 {strides = array<i32>} : memref<8x8x256xi32, #tpu.memory_space<vmem>>, vector<1x8x256xi32>,
    %c17_i32 = arith.constant 17 : i32
    %109 = vector.broadcast %c17_i32 : i32 to vector<8x256xi32>
    %110 = arith.addi %80, %109 : vector<8x256xi32>
    %c6_27 = arith.constant 6 : index
    %c0_28 = arith.constant 0 : index
    %c0_29 = arith.constant 0 : index
    %111 = vector.load %arg3[%c6_27, %c0_28, %c0_29] : memref<8x8x256xi32, #tpu.memory_space<vmem>>, vector<1x8x256xi32>
    %112 = vector.shape_cast %111 : vector<1x8x256xi32> to vector<8x256xi32>
    %113 = vector.shape_cast %110 : vector<8x256xi32> to vector<1x8x256xi32>
    tpu.vector_store %arg3[%c6_27, %c0_28, %c0_29], %113 {strides = array<i32>} : memref<8x8x256xi32, #tpu.memory_space<vmem>>, vector<1x8x256xi32>,
    %c273_i32 = arith.constant 273 : i32
    %114 = vector.broadcast %c273_i32 : i32 to vector<8x256xi32>
    %115 = arith.addi %80, %114 : vector<8x256xi32>
    %c7_30 = arith.constant 7 : index
    %c0_31 = arith.constant 0 : index
    %c0_32 = arith.constant 0 : index
    %116 = vector.load %arg3[%c7_30, %c0_31, %c0_32] : memref<8x8x256xi32, #tpu.memory_space<vmem>>, vector<1x8x256xi32>
    %117 = vector.shape_cast %116 : vector<1x8x256xi32> to vector<8x256xi32>
    %118 = vector.shape_cast %115 : vector<8x256xi32> to vector<1x8x256xi32>
    tpu.vector_store %arg3[%c7_30, %c0_31, %c0_32], %118 {strides = array<i32>} : memref<8x8x256xi32, #tpu.memory_space<vmem>>, vector<1x8x256xi32>,
    return
  }
  func.func @transform_0(%arg0: i32) -> i32 {
    %c0_i32 = arith.constant 0 : i32
    %c0_i32_0 = arith.constant 0 : i32
    return %c0_i32 : i32
  }
  func.func @transform_1(%arg0: i32) -> (i32, i32) {
    %c0_i32 = arith.constant 0 : i32
    %c0_i32_0 = arith.constant 0 : i32
    %c0_i32_1 = arith.constant 0 : i32
    return %c0_i32, %c0_i32_0 : i32, i32
  }
  func.func @transform_2(%arg0: i32) -> (i32, i32, i32) {
    %c0_i32 = arith.constant 0 : i32
    %c0_i32_0 = arith.constant 0 : i32
    %c0_i32_1 = arith.constant 0 : i32
    return %c0_i32, %arg0, %c0_i32_0 : i32, i32, i32
  }
}

</mosaic_0001>

<bundles_post_ra>
// kernel: tpu_custom_call.1
= control target key start
LH: loop header
LB: loop body
LE: loop exit
PB: predicated region body
PF: predicated region fallthrough
CT: control target
= control target key end

     0   :  { %7 = vsyncpa [#allocation5], 0  ;;  %s907_s0 = inlined_call_operand.hbm [shape: f32[12], index: 0, kind: input, shape index: {}]   ;;  %s908_s1 = inlined_call_operand.hbm [shape: f32[2,256], index: 1, kind: input, shape index: {}]   ;;  %s909_s2 = inlined_call_operand.hbm [shape: s32[8,16,256], index: 2, kind: output, shape index: {}]  }
   0x1   :  { %8 = vsyncpa [#allocation3], 0 }
   0x2   :  { %9 = vsyncpa [#allocation4], 0 }
   0x3   :  { %11 = vsyncpa [#allocation4 + $0x1], 0  ;;  %s720_s9 = smov 0   ;;  %s722_s10 = smov 0  }
   0x4   :  { %s724_s11 = smov 0   ;;  %s726_s12 = smov 0  }
   0x5 LB: > { %s741_s13 = sadd.s32 4294967295, %s697_s12   ;;  %s477_s14 = sadd.s32 4294967294, %s697_s12   ;;  %s697_s12 = sphi %s726_s12, %s917_s12   ;;  %s693_s11 = sphi %s724_s11, %s916_s11   ;;  %s689_s10 = sphi %s722_s10, %s915_s10   ;;  %s685_s9 = sphi %s720_s9, %s914_s9  }
   0x6   : > { %s745_s15 = sadd.s32 1, %s697_s12   ;;  %s66_s16 = sadd.s32 1, %s693_s11 }
   0x7   : > { %s63_s17 = ssub.s32 %s697_s12, %s745_s15  ;;  %p76_p0 = scmp.ne.s32.totalorder %s693_s11, %s689_s10 }
   0x8   : > { %p64_p1 = scmp.eq.s32.totalorder %s63_s17, 0  ;;  %p77_p2 = scmp.eq.s32.totalorder %s741_s13, 1 }
   0x9   : > { %p82_p3 = scmp.ne.s32.totalorder %s689_s10, %s685_s9  ;;  %p83_p4 = scmp.eq.s32.totalorder %s477_s14, 1 }
   0xa   : > { %s756_s18 = scalar_select %p64_p1, %s693_s11, %s66_s16  }
   0xb   : > { %p758_p5 = por %p77_p2, %p76_p0  ;;  %p762_p6 = por %p83_p4, %p82_p3 }
   0xc   : > { %p478_p7 = scmp.ge.s32.totalorder %s697_s12, 1  ;;  %p90_p8 = scmp.lt.s32.totalorder %s697_s12, 3 }
   0xd   : > { %p550_p10 = scmp.eq.s32.totalorder %s741_s13, 0  ;;  %s699_s22 = smov [#allocation6]  }
   0xe   : > { %p768_p9 = pnand %p478_p7, %p90_p8  ;;  %s112_s23 = sshll.u32 %s699_s22, 4  ;;  %s113_s23 = int_to_ptr.vmem [resolvable:$true] %s112_s23 }
   0xf   : > { %s700_s25 = smov [#allocation2]   ;;  %s614_s28 = scalar_lea.vmem %s113_s23, 64 }
  0x10   : > { %p539_p11 = pneg %p768_p9  ;;  %p615_p0 = scmp.ne.s32.totalorder %s113_s23, %s614_s28 }
  0x11   : > { %p622_p3 = scmp.lt.s32.totalorder %s113_s23, %s113_s23  ;;  %p623_p4 = scmp.lt.s32.totalorder %s614_s28, %s614_s28 }
  0x12   : > { %p777_p12 = pnand %p550_p10, %p539_p11 }
  0x13   : > { %p624_p7 = por %p623_p4, %p622_p3 }
  0x14   : > { %542 = dma.hbm_to_smem (!%p777_p12), %s907_s0, 16, %s700_s25, [#allocation5]  }
  0x15   : > { %p605_p13 = pneg %p777_p12 }
  0x17   : > { %p617_p1 = pnand %p615_p0, %p605_p13 }
  0x19   : > { %p618_p2 = pneg %p617_p1 }
  0x1b   : > { %p625_p8 = pnand %p624_p7, %p618_p2 }
  0x1d   : > { %628 = shalt.err (!%p625_p8)
}
  0x1e   : > { %545 = dma.hbm_to_vmem [thread:$0]  (!%p777_p12), %s908_s1, 64, %s113_s23, [#allocation3]  }
  0x1f   : > { %125 = sbr.rel (%p768_p9) target bundleno = 105 (0x69), region = 28 }
  0x24   : > { %672 = dma.done.wait (%p550_p10), [#allocation5], 16  }
  0x25   : > { %674 = vsyncadd (%p550_p10), [#allocation5], 4294967280 }
  0x26   : > { %676 = dma.done.wait (%p550_p10), [#allocation3], 64  }
  0x27   : > { %678 = vsyncadd (%p550_p10), [#allocation3], 4294967232 }
  0x28   : > { %135 = sfence }
  0x29   : > { %s485_s3 = sshll.u32 %s741_s13, 3  ;;  %v149_v0 = vlaneseq  ;;  %s155_s5 = sld [smem:[#allocation2]]  ;;  %v154_v4 = vld [vmem:[#allocation6] sm:$0xf] }
  0x2a   : > { %s148_s4 = scvt.s32.f32 %s485_s3  ;;  %s486_s6 = sld [smem:[#allocation2 + $0x1]] }
  0x2b   : > { %v150_v1 = vshrl.u32 %v149_v0, 7  ;;  %s487_s7 = sld [smem:[#allocation2 + $0x2]]  ;;  %s144_s26 = sand.u32 1, %s689_s10  }
  0x2c   : > { %v152_v3 = vstv %s148_s4  ;;  %s804_s8 = sld [smem:[#allocation2 + $0x3]]  ;;  %s484_s27 = sshll.u32 %s144_s26, 7 }
  0x2d   : > { %v151_v2 = vcvt.s32.f32 %v150_v1  ;;  %s806_s14 = sld [smem:[#allocation2 + $0x4]]  ;;  %v164_v6 = vsub.s32 0, %v150_v1  ;;  %v168_v7 = vsub.s32 2, %v150_v1  ;;  %v808_v10 = vsub.s32 1, %v150_v1  ;;  %s516_s28 = sshll.u32 %s741_s13, 8 }
  0x2e   : > { %s490_s16 = sld [smem:[#allocation2 + $0x5]]  ;;  %v812_v11 = vsub.s32 3, %v150_v1  ;;  %s839_s29 = scalar_lea.vmem [#allocation7], %s484_s27 }
  0x2f   : > { %v153_v5 = vadd.f32 %v152_v3, %v151_v2  ;;  %s491_s17 = sld [smem:[#allocation2 + $0x6]]  ;;  %v156_v8 = vstv %s155_s5  ;;  %s403_s30 = sshll.u32 %s839_s29, 4  ;;  %s856_s30 = int_to_ptr.vmem [resolvable:$true] %s403_s30 }
  0x30   : > { %v159_v9 = vstv %s486_s6  ;;  %s810_s21 = sld [smem:[#allocation2 + $0x7]]  ;;  %s850_s4 = scalar_lea.hbm %s909_s2, %s516_s28 }
  0x31   : > { %v160_v12 = vmul.f32 %v159_v9, %v154_v4  ;;  %v183_v13 = vstv %s487_s7  ;;  %s814_s22 = sld [smem:[#allocation2 + $0x8]]  ;;  %v157_v15 = vmul.f32 %v156_v8, %v153_v5  ;;  %s867_s5 = scalar_lea.sflag [#allocation4], %s144_s26 }
  0x32   : > { %v184_v14 = vmul.f32 %v183_v13, %v154_v4  ;;  %s494_s23 = sld [smem:[#allocation2 + $0x9]]  ;;  %v207_v20 = vstv %s804_s8  ;;  %s629_s6 = scalar_lea.vmem %s856_s30, 2048 }
  0x33   : > { %v165_v16 = vrot.slane %v160_v12, %v164_v6  ;;  %v211_v17 = vstv %s806_s14  ;;  %s495_s24 = sld [smem:[#allocation2 + $0xa]]  ;;  %v169_v18 = vrot.slane %v160_v12, %v168_v7  ;;  %p630_p9 = scmp.ne.s32.totalorder %s856_s30, %s629_s6 }
  0x34   : > { %v189_v19 = vrot.slane %v184_v14, %v808_v10  ;;  %v214_v21 = vstv %s490_s16  ;;  %v193_v22 = vrot.slane %v184_v14, %v812_v11  ;;  %v212_v28 = vmul.f32 %v211_v17, %v153_v5  ;;  %s825_s25 = sld [smem:[#allocation2 + $0xb]]  ;;  %s701_s7 = smov [#allocation7]  }
  0x35   : > { %v175_v23 = vrot.slane %v165_v16, %v164_v6  ;;  %v215_v24 = vmul.f32 %v214_v21, %v154_v4  ;;  %v238_v25 = vstv %s491_s17  ;;  %v179_v26 = vrot.slane %v169_v18, %v164_v6  ;;  %p631_p10 = pnand %p630_p9, %p758_p5  ;;  %s633_s8 = sshll.u32 %s701_s7, 4  ;;  %s634_s8 = int_to_ptr.vmem [resolvable:$false] %s633_s8 }
  0x36   : > { %v199_v27 = vrot.slane %v189_v19, %v808_v10  ;;  %v239_v29 = vmul.f32 %v238_v25, %v154_v4  ;;  %v203_v30 = vrot.slane %v193_v22, %v808_v10  ;;  %v262_v36 = vstv %s810_s21  ;;  %s635_s14 = scalar_lea.vmem %s634_s8, 4096  ;;  %p636_p12 = scmp.lt.s32.totalorder %s856_s30, %s634_s8 }
  0x37   : > { %v180_v31 = vadd.f32 %v175_v23, %v157_v15  ;;  %v220_v32 = vrot.slane %v215_v24, %v164_v6  ;;  %v266_v33 = vstv %s814_s22  ;;  %v181_v34 = vadd.f32 %v179_v26, %v157_v15  ;;  %p632_p11 = pneg %p631_p10  ;;  %p637_p13 = scmp.lt.s32.totalorder %s635_s14, %s629_s6 }
  0x38   : > { %v244_v35 = vrot.slane %v239_v29, %v808_v10  ;;  %v269_v37 = vstv %s494_s23  ;;  %v224_v38 = vrot.slane %v215_v24, %v168_v7  ;;  %v267_v44 = vmul.f32 %v266_v33, %v153_v5 }
  0x39   : > { %v204_v39 = vadd.f32 %v199_v27, %v180_v31  ;;  %v230_v40 = vrot.slane %v220_v32, %v164_v6  ;;  %v270_v41 = vmul.f32 %v269_v37, %v154_v4  ;;  %v293_v42 = vstv %s495_s24  ;;  %p638_p0 = por %p637_p13, %p636_p12 }
  0x3a   : > { %v254_v43 = vrot.slane %v244_v35, %v808_v10  ;;  %v294_v45 = vmul.f32 %v293_v42, %v154_v4  ;;  %v205_v46 = vadd.f32 %v203_v30, %v181_v34  ;;  %v234_v50 = vrot.slane %v224_v38, %v164_v6 }
  0x3b   : > { %v208_v47 = vadd.f32 %v207_v20, %v204_v39  ;;  %v235_v48 = vadd.f32 %v230_v40, %v212_v28  ;;  %v275_v49 = vrot.slane %v270_v41, %v164_v6  ;;  %v248_v53 = vrot.slane %v239_v29, %v812_v11  ;;  %p639_p1 = pnand %p638_p0, %p632_p11 }
  0x3c   : > { %v299_v51 = vrot.slane %v294_v45, %v808_v10  ;;  %v209_v52 = vadd.f32 %v207_v20, %v205_v46  ;;  %v279_v54 = vrot.slane %v270_v41, %v168_v7  ;;  %v236_v58 = vadd.f32 %v234_v50, %v212_v28 }
  0x3d   : > { %v259_v55 = vadd.f32 %v254_v43, %v235_v48  ;;  %v285_v56 = vrot.slane %v275_v49, %v164_v6  ;;  %v320_v57 = vfloor.f32 %v208_v47  ;;  %v258_v60 = vrot.slane %v248_v53, %v808_v10 }
  0x3e   : > { %v309_v59 = vrot.slane %v299_v51, %v808_v10  ;;  %v289_v61 = vrot.slane %v279_v54, %v164_v6  ;;  %v303_v62 = vrot.slane %v294_v45, %v812_v11  ;;  %v321_v2 = vfloor.f32 %v209_v52 }
  0x3f   : > { %v263_v63 = vadd.f32 %v262_v36, %v259_v55  ;;  %v290_v0 = vadd.f32 %v285_v56, %v267_v44  ;;  %v322_v1 = vmax.f32 %v320_v57, 0.0  ;;  %v317_v3 = vstv %s825_s25 }
  0x40   : > { %v260_v4 = vadd.f32 %v258_v60, %v236_v58  ;;  %v291_v5 = vadd.f32 %v289_v61, %v267_v44  ;;  %v313_v7 = vrot.slane %v303_v62, %v808_v10  ;;  %v323_v13 = vmax.f32 %v321_v2, 0.0 }
  0x41   : > { %v314_v8 = vadd.f32 %v309_v59, %v290_v0  ;;  %v324_v9 = vmin.f32 %v322_v1, 15.0  ;;  %v328_v12 = vfloor.f32 %v263_v63 }
  0x42   : > { %v264_v14 = vadd.f32 %v262_v36, %v260_v4  ;;  %v315_v15 = vadd.f32 %v313_v7, %v291_v5  ;;  %v325_v11 = vmin.f32 %v323_v13, 15.0 }
  0x43   : > { %v318_v16 = vadd.f32 %v317_v3, %v314_v8  ;;  %v517_v6 = vtrunc.f32 %v324_v9  ;;  %v330_v17 = vmax.f32 %v328_v12, 0.0 }
  0x44   : > { %v319_v18 = vadd.f32 %v317_v3, %v315_v15  ;;  %v329_v19 = vfloor.f32 %v264_v14  ;;  %v519_v23 = vtrunc.f32 %v325_v11 }
  0x45   : > { %v518_v20 = vcvt.f32.s32 %v517_v6  ;;  %v332_v21 = vmin.f32 %v330_v17, 15.0  ;;  %v336_v22 = vfloor.f32 %v318_v16 }
  0x46   : > { %v331_v24 = vmax.f32 %v329_v19, 0.0  ;;  %v337_v10 = vfloor.f32 %v319_v18  ;;  %v520_v28 = vcvt.f32.s32 %v519_v23 }
  0x47   : > { %v521_v25 = vtrunc.f32 %v332_v21  ;;  %v338_v26 = vmax.f32 %v336_v22, 0.0  ;;  %v344_v27 = vmul.u32 16, %v518_v20 }
  0x48   : > { %v333_v29 = vmin.f32 %v331_v24, 15.0  ;;  %v339_v30 = vmax.f32 %v337_v10, 0.0  ;;  %v345_v35 = vmul.u32 16, %v520_v28 }
  0x49   : > { %v522_v31 = vcvt.f32.s32 %v521_v25  ;;  %v340_v32 = vmin.f32 %v338_v26, 15.0 }
  0x4a   : > { %v523_v33 = vtrunc.f32 %v333_v29  ;;  %v341_v34 = vmin.f32 %v339_v30, 15.0 }
  0x4b   : > { %v525_v36 = vtrunc.f32 %v340_v32  ;;  %v346_v37 = vadd.s32 %v522_v31, %v344_v27 }
  0x4c   : > { %v524_v38 = vcvt.f32.s32 %v523_v33  ;;  %v527_v39 = vtrunc.f32 %v341_v34 }
  0x4d   : > { %v526_v40 = vcvt.f32.s32 %v525_v36  ;;  %v348_v41 = vmul.u32 16, %v346_v37 }
  0x4e   : > { %v528_v42 = vcvt.f32.s32 %v527_v39  ;;  %v347_v43 = vadd.s32 %v524_v38, %v345_v35 }
  0x4f   : > { %v350_v44 = vadd.s32 %v526_v40, %v348_v41 }
  0x50   : > { %v349_v45 = vmul.u32 16, %v347_v43 }
  0x51   : > { %352 = vst [vmem:[%s839_s29] sm:$0xff] %v350_v44  ;;  %v354_v46 = vadd.s32 256, %v350_v44  ;;  %v359_v47 = vadd.s32 16, %v350_v44  ;;  %v364_v48 = vadd.s32 272, %v350_v44  ;;  %v369_v49 = vadd.s32 1, %v350_v44 }
  0x52   : > { %v351_v50 = vadd.s32 %v528_v42, %v349_v45  ;;  %v374_v51 = vadd.s32 257, %v350_v44  ;;  %v379_v52 = vadd.s32 17, %v350_v44  ;;  %v384_v53 = vadd.s32 273, %v350_v44 }
  0x53   : > { %497 = vst [vmem:[%s839_s29 + $0x10] sm:$0xff] %v354_v46  ;;  %499 = vst [vmem:[%s839_s29 + $0x20] sm:$0xff] %v359_v47 }
  0x54   : > { %501 = vst [vmem:[%s839_s29 + $0x30] sm:$0xff] %v364_v48  ;;  %503 = vst [vmem:[%s839_s29 + $0x40] sm:$0xff] %v369_v49  ;;  %v355_v54 = vadd.s32 256, %v351_v50  ;;  %v360_v55 = vadd.s32 16, %v351_v50  ;;  %v365_v56 = vadd.s32 272, %v351_v50  ;;  %v370_v57 = vadd.s32 1, %v351_v50 }
  0x55   : > { %353 = vst [vmem:[%s839_s29 + $0x8] sm:$0xff] %v351_v50  ;;  %505 = vst [vmem:[%s839_s29 + $0x50] sm:$0xff] %v374_v51  ;;  %v375_v58 = vadd.s32 257, %v351_v50  ;;  %v380_v59 = vadd.s32 17, %v351_v50  ;;  %v385_v60 = vadd.s32 273, %v351_v50 }
  0x56   : > { %507 = vst [vmem:[%s839_s29 + $0x60] sm:$0xff] %v379_v52  ;;  %509 = vst [vmem:[%s839_s29 + $0x70] sm:$0xff] %v384_v53 }
  0x57   : > { %498 = vst [vmem:[%s839_s29 + $0x18] sm:$0xff] %v355_v54  ;;  %500 = vst [vmem:[%s839_s29 + $0x28] sm:$0xff] %v360_v55 }
  0x58   : > { %502 = vst [vmem:[%s839_s29 + $0x38] sm:$0xff] %v365_v56  ;;  %504 = vst [vmem:[%s839_s29 + $0x48] sm:$0xff] %v370_v57 }
  0x59   : > { %506 = vst [vmem:[%s839_s29 + $0x58] sm:$0xff] %v375_v58  ;;  %508 = vst [vmem:[%s839_s29 + $0x68] sm:$0xff] %v380_v59 }
  0x5a   : > { %510 = vst [vmem:[%s839_s29 + $0x78] sm:$0xff] %v385_v60 }
  0x5b   : > { %642 = shalt.err (!%p639_p1)
}
  0x5c   : > { %s643_s16 = scalar_lea.hbm %s850_s4, 2048  ;;  %s647_s22 = scalar_lea.hbm %s909_s2, 4096 }
  0x5d   : > { %p644_p2 = scmp.ne.s32.totalorder %s850_s4, %s643_s16  ;;  %p648_p7 = scmp.lt.s32.totalorder %s850_s4, %s909_s2 }
  0x5e   : > { %p649_p8 = scmp.lt.s32.totalorder %s647_s22, %s643_s16 }
  0x5f   : > { %p645_p3 = pnand %p644_p2, %p758_p5 }
  0x60   : > { %p650_p9 = por %p649_p8, %p648_p7 }
  0x61   : > { %p646_p4 = pneg %p645_p3 }
  0x63   : > { %p651_p10 = pnand %p650_p9, %p646_p4 }
  0x65   : > { %654 = shalt.err (!%p651_p10)
}
  0x66   : > { %s702_s25 = smov 256   ;;  %s703_s26 = smov 512  }
  0x67   : > { %s704_s27 = smov 16  }
  0x68   : > { %537 = dma.vmem_to_hbm [thread:$0]  (%p758_p5), %s856_s30, 2048, %s850_s4, %s867_s5, %s702_s25, %s703_s26, %s704_s27  }
  0x69 PF: > { %p554_p11 = scmp.ge.s32.totalorder %s697_s12, 2  ;;  %s418_s28 = sand.u32 1, %s685_s9  }
  0x6a   : > { %s419_s29 = scalar_lea.sflag [#allocation4], %s418_s28 }
  0x6b   : > { %p547_p12 = pnand %p554_p11, %p762_p6 }
  0x6d   : > { %p548_p13 = pneg %p547_p12 }
  0x6f   : > { %680 = dma.done.wait (%p548_p13), %s419_s29, 2048  }
  0x70   : > { %682 = vsyncadd (%p548_p13), %s419_s29, 4294965248  ;;  %p14_p0 = scmp.ge.s32.totalorder %s745_s15, 4   ;;  %s914_s9 = smov %s689_s10 }
  0x71   : > { %s915_s10 = smov %s693_s11  ;;  %s916_s11 = smov %s756_s18 }
  0x72   : > { %s917_s12 = smov %s745_s15  ;;  %16 = sbr.rel (!%p14_p0) target bundleno = 5 (0x5), region = 77 }
  0x77   :  { %424 = vsyncpa [#allocation3], 1 }
  0x78   :  { %426 = vsyncpa [#allocation3 + $0x1], 1 }
  0x79   :  { %427 = vsyncpa [#allocation4], 1 }
  0x7a   :  { %429 = vsyncpa [#allocation4 + $0x1], 1 }
  0x7b   :  { %430 = vsyncpa [#allocation5], 1 }
  0x7c   :  { %432 = vsyncpa [#allocation5 + $0x1], 1 }

</bundles_post_ra>
